<compile_context>
chip_gen: v5e
topology: v5e:2x2
jax: 0.10.0
libtpu: 0.0.40
codegen_flags: <defaults>
</compile_context>

<pallas_src>
import jax
import jax.numpy as jnp
from jax.experimental import pallas as pl
from jax.experimental.pallas import tpu as pltpu


def column_decoder_kernel(x_ref, wbd_ref, b_ref, o_ref):
    # x_ref: [TB, C*D]  wbd_ref: [C*D, C]  b_ref: [1, C]  o_ref: [TB, C]
    out = jnp.dot(
        x_ref[...],
        wbd_ref[...],
        preferred_element_type=jnp.float32,
        precision=jax.lax.Precision.HIGHEST,  # keep true f32 vs the reference
    )
    o_ref[...] = (out + b_ref[...].astype(jnp.float32)).astype(o_ref.dtype)


def _choose_batch_tile(B, *, max_tile=4096, min_steps=4):
    # Large tiles (1-2 MiB X blocks at C*D=128, f32) amortize the ~0.35us
    # per-grid-step cost; >= min_steps grid steps keeps both v7x TensorCores
    # busy with a double-buffered stream each.  Tile is a multiple of 8
    # sublanes; the wrapper pads the batch up to a multiple of the tile.
    tile = -(-B // min_steps)        # ceil(B / min_steps)
    tile = -(-tile // 8) * 8         # round up to a sublane multiple
    return max(8, min(tile, max_tile))


def column_decoder(x_flat, weights, bias, *, num_cols, d_col, batch_tile=None):
    """x_flat: [B, num_cols*d_col], weights: [num_cols, d_col], bias: [num_cols]."""
    B = x_flat.shape[0]
    C, D = num_cols, d_col
    assert x_flat.shape[1] == C * D

    if batch_tile is None:
        batch_tile = _choose_batch_tile(B)
    batch_tile = max(8, -(-batch_tile // 8) * 8)

    # Pad the batch up to a multiple of the tile (zero rows, sliced off below)
    # so awkward batch sizes never fall back to tiny overhead-bound tiles.
    Bp = -(-B // batch_tile) * batch_tile
    xp = x_flat if Bp == B else jnp.pad(x_flat, ((0, Bp - B), (0, 0)))

    # Glue (host-side, once): block-diagonal weight so the per-column dot is a
    # single lane-dense matmul.  Wbd[c*D + d, c] = W[c, d], zeros elsewhere.
    eye = jnp.eye(C, dtype=weights.dtype)                       # [C, C]
    wbd = (weights[:, :, None] * eye[:, None, :]).reshape(C * D, C)
    b2 = bias.reshape(1, C)

    grid = (Bp // batch_tile,)
    out = pl.pallas_call(
        column_decoder_kernel,
        out_shape=jax.ShapeDtypeStruct((Bp, C), x_flat.dtype),
        grid_spec=pltpu.PrefetchScalarGridSpec(
            num_scalar_prefetch=0,
            grid=grid,
            in_specs=[
                # Flat, lane-dense X block: last dim C*D (=128 here).
                pl.BlockSpec((batch_tile, C * D), lambda i: (i, 0)),
                # Tiny block-diagonal weight, resident across all grid steps.
                pl.BlockSpec((C * D, C), lambda i: (0, 0)),
                pl.BlockSpec((1, C), lambda i: (0, 0)),
            ],
            out_specs=pl.BlockSpec((batch_tile, C), lambda i: (i, 0)),
        ),
        compiler_params=pltpu.CompilerParams(
            dimension_semantics=("parallel",),
        ),
    )(xp, wbd, b2)
    return out if Bp == B else out[:B]


def column_decoder_ref(x_flat, weights, bias, *, num_cols, d_col):
    """Pure-JAX reference matching the PyTorch loop exactly."""
    cols = []
    for i in range(num_cols):
        col = x_flat[:, i * d_col:(i + 1) * d_col]              # [B, D]
        cols.append(col @ weights[i][:, None] + bias[i])        # [B, 1]
    return jnp.concatenate(cols, axis=1)                        # [B, C]


if __name__ == "__main__":
    num_cols = 8   # number of per-column decoders
    d_col = 16     # features per column  (C*D = 128 -> lane-dense)

    key = jax.random.PRNGKey(0)
    kx, kw, kb = jax.random.split(key, 3)

    # Deterministic parameter init mimicking nn.Linear default:
    # uniform(-1/sqrt(d_col), 1/sqrt(d_col)) for both weight and bias.
    bound = 1.0 / (d_col ** 0.5)
    weights = jax.random.uniform(kw, (num_cols, d_col), jnp.float32, -bound, bound)
    bias = jax.random.uniform(kb, (num_cols,), jnp.float32, -bound, bound)

    # Case 1: batch divisible by the chosen tile (exercises multi-step grid).
    B = 256
    x = jax.random.normal(kx, (B, num_cols * d_col), dtype=jnp.float32)
    out = jax.block_until_ready(
        column_decoder(x, weights, bias, num_cols=num_cols, d_col=d_col))
    ref = column_decoder_ref(x, weights, bias, num_cols=num_cols, d_col=d_col)
    assert out.shape == (B, num_cols), out.shape
    assert jnp.allclose(out, ref, atol=1e-5, rtol=1e-5), (
        f"max abs err {jnp.max(jnp.abs(out - ref))}")

    # Case 2: awkward batch size (exercises the zero-pad + slice path).
    B2 = 100
    x2 = jax.random.normal(kx, (B2, num_cols * d_col), dtype=jnp.float32)
    out2 = jax.block_until_ready(
        column_decoder(x2, weights, bias, num_cols=num_cols, d_col=d_col))
    ref2 = column_decoder_ref(x2, weights, bias, num_cols=num_cols, d_col=d_col)
    assert out2.shape == (B2, num_cols), out2.shape
    assert jnp.allclose(out2, ref2, atol=1e-5, rtol=1e-5), (
        f"max abs err {jnp.max(jnp.abs(out2 - ref2))}")

    print("KERNEL_OK")
</pallas_src>

<mosaic_0001>
module attributes {stable_mosaic.version = 11 : i64} {
  func.func @column_decoder_kernel(%arg0: i32, %arg1: memref<64x128xf32, #tpu.memory_space<vmem>>, %arg2: memref<128x8xf32, #tpu.memory_space<vmem>>, %arg3: memref<1x8xf32, #tpu.memory_space<vmem>>, %arg4: memref<64x8xf32, #tpu.memory_space<vmem>>) attributes {dimension_semantics = [#tpu.dimension_semantics<parallel>], iteration_bounds = array<i64: 4>, scalar_prefetch = 0 : i64, scratch_operands = 0 : i64, tpu.core_type = #tpu.core_type<tc>, window_params = [{transform_indices = @transform_0, window_bounds = array<i64: 64, 128>}, {pipeline_mode = #tpu.pipeline_mode<synchronous>, transform_indices = @transform_1, window_bounds = array<i64: 128, 8>}, {pipeline_mode = #tpu.pipeline_mode<synchronous>, transform_indices = @transform_2, window_bounds = array<i64: 1, 8>}, {transform_indices = @transform_3, window_bounds = array<i64: 64, 8>}]} {
    %c0 = arith.constant 0 : index
    %c0_0 = arith.constant 0 : index
    %0 = vector.load %arg1[%c0, %c0_0] : memref<64x128xf32, #tpu.memory_space<vmem>>, vector<64x128xf32>
    %c0_1 = arith.constant 0 : index
    %c0_2 = arith.constant 0 : index
    %1 = vector.load %arg2[%c0_1, %c0_2] : memref<128x8xf32, #tpu.memory_space<vmem>>, vector<128x8xf32>
    %cst = arith.constant dense<0.000000e+00> : vector<64x8xf32>
    %2 = tpu.matmul %0, %1, %cst {dimension_numbers = #tpu.dot_dimension_numbers<[1], [0], [0], [1], [0, 0, 1, 1], [], []>, precision = #tpu.contract_precision<fp32>} : vector<64x128xf32>, vector<128x8xf32>, vector<64x8xf32> -> vector<64x8xf32>
    %c0_3 = arith.constant 0 : index
    %c0_4 = arith.constant 0 : index
    %3 = vector.load %arg3[%c0_3, %c0_4] : memref<1x8xf32, #tpu.memory_space<vmem>>, vector<1x8xf32>
    %4 = vector.broadcast %3 : vector<1x8xf32> to vector<64x8xf32>
    %5 = arith.addf %2, %4 : vector<64x8xf32>
    %c0_5 = arith.constant 0 : index
    %c0_6 = arith.constant 0 : index
    %6 = vector.load %arg4[%c0_5, %c0_6] : memref<64x8xf32, #tpu.memory_space<vmem>>, vector<64x8xf32>
    tpu.vector_store %arg4[%c0_5, %c0_6], %5 {strides = array<i32>} : memref<64x8xf32, #tpu.memory_space<vmem>>, vector<64x8xf32>,
    return
  }
  func.func @transform_0(%arg0: i32) -> (i32, i32) {
    %c0_i32 = arith.constant 0 : i32
    %c0_i32_0 = arith.constant 0 : i32
    return %arg0, %c0_i32 : i32, i32
  }
  func.func @transform_1(%arg0: i32) -> (i32, i32) {
    %c0_i32 = arith.constant 0 : i32
    %c0_i32_0 = arith.constant 0 : i32
    %c0_i32_1 = arith.constant 0 : i32
    return %c0_i32, %c0_i32_0 : i32, i32
  }
  func.func @transform_2(%arg0: i32) -> (i32, i32) {
    %c0_i32 = arith.constant 0 : i32
    %c0_i32_0 = arith.constant 0 : i32
    %c0_i32_1 = arith.constant 0 : i32
    return %c0_i32, %c0_i32_0 : i32, i32
  }
  func.func @transform_3(%arg0: i32) -> (i32, i32) {
    %c0_i32 = arith.constant 0 : i32
    %c0_i32_0 = arith.constant 0 : i32
    return %arg0, %c0_i32 : i32, i32
  }
}

</mosaic_0001>

<bundles_post_ra>
// kernel: tpu_custom_call.1
= control target key start
LH: loop header
LB: loop body
LE: loop exit
PB: predicated region body
PF: predicated region fallthrough
CT: control target
= control target key end

     0   :  { %8 = vsyncpa [#allocation3], 0  ;;  %s1601_s0 = inlined_call_operand.hbm [shape: f32[256,128], index: 0, kind: input, shape index: {}]   ;;  %s1602_s1 = inlined_call_operand.vmem [shape: f32[128,8], index: 1, kind: input, shape index: {}]   ;;  %s1603_s2 = inlined_call_operand.vmem [shape: f32[1,8], index: 2, kind: input, shape index: {}]   ;;  %s1604_s3 = inlined_call_operand.vmem [shape: f32[256,8], index: 3, kind: output, shape index: {}]  }
   0x1   :  { %10 = vsyncpa [#allocation3 + $0x1], 0  ;;  %s1033_s12 = smov 0   ;;  %s1035_s13 = smov 0  }
   0x2   :  { %s1037_s14 = smov 0   ;;  %s1039_s15 = smov 0  }
   0x3 LB: > { %s857_s16 = sadd.s32 4294967295, %s1009_s15   ;;  %s1053_s17 = sadd.s32 1, %s1009_s15   ;;  %s1009_s15 = sphi %s1039_s15, %s1631_s15   ;;  %s1005_s14 = sphi %s1037_s14, %s1630_s14   ;;  %s1001_s13 = sphi %s1035_s13, %s1629_s13   ;;  %s997_s12 = sphi %s1033_s12, %s1628_s12  }
   0x4   : > { %s20_s18 = ssub.s32 %s1009_s15, %s1053_s17  ;;  %s23_s19 = sadd.s32 1, %s1005_s14 }
   0x5   : > { %p21_p0 = scmp.eq.s32.totalorder %s20_s18, 0  ;;  %p30_p1 = scmp.ne.s32.totalorder %s1005_s14, %s1001_s13 }
   0x6   : > { %p31_p2 = scmp.eq.s32.totalorder %s1009_s15, 0  ;;  %p36_p3 = scmp.ne.s32.totalorder %s1001_s13, %s997_s12 }
   0x7   : > { %s1063_s20 = scalar_select %p21_p0, %s1005_s14, %s23_s19  }
   0x8   : > { %p1065_p4 = por %p31_p2, %p30_p1  ;;  %p37_p5 = scmp.eq.s32.totalorder %s857_s16, 0 }
   0x9   : > { %p909_p6 = scmp.lt.s32.totalorder %s1009_s15, 4  ;;  %s134_s23 = sand.u32 1, %s1005_s14  }
   0xa   : > { %p1072_p7 = por %p37_p5, %p36_p3  ;;  %s861_s24 = sshll.u32 %s134_s23, 6 }
   0xb   : > { %s870_s25 = sshll.u32 %s1009_s15, 6  ;;  %s138_s29 = scalar_lea.vmem [#allocation2], %s861_s24 }
   0xc   : > { %s143_s28 = scalar_lea.hbm %s1601_s0, %s870_s25  ;;  %s146_s30 = sshll.u32 %s138_s29, 4  ;;  %s147_s30 = int_to_ptr.vmem [resolvable:$true] %s146_s30 }
   0xd   : > { %s144_s4 = sshll.u32 %s143_s28, 4  ;;  %p1083_p8 = pnand %p909_p6, %p1065_p4  ;;  %s145_s4 = int_to_ptr.hbm [resolvable:$true] %s144_s4 }
   0xe   : > { %p864_p9 = scmp.ge.s32.totalorder %s1009_s15, 1  ;;  %s135_s6 = scalar_lea.sflag [#allocation3], %s134_s23 }
   0xf   : > { %s945_s7 = sshra.s32 %s145_s4, 4  ;;  %p949_p11 = pneg %p1083_p8  ;;  %s946_s7 = int_to_ptr.hbm [resolvable:$true] %s945_s7 }
  0x10   : > { %s947_s8 = scalar_lea.hbm %s946_s7, 64  ;;  %s952_s11 = scalar_lea.hbm %s1601_s0, 256 }
  0x11   : > { %p948_p10 = scmp.ne.s32.totalorder %s946_s7, %s947_s8  ;;  %p953_p0 = scmp.lt.s32.totalorder %s946_s7, %s1601_s0 }
  0x12   : > { %p954_p1 = scmp.lt.s32.totalorder %s952_s11, %s947_s8 }
  0x13   : > { %p950_p12 = pnand %p949_p11, %p948_p10 }
  0x14   : > { %p955_p2 = por %p954_p1, %p953_p0 }
  0x15   : > { %p951_p13 = pneg %p950_p12 }
  0x17   : > { %p956_p3 = pnand %p955_p2, %p951_p13 }
  0x19   : > { %959 = shalt.err (!%p956_p3)
}
  0x1a   : > { %s1011_s19 = smov 128   ;;  %s1012_s21 = smov 8  }
  0x1b   : > { %908 = dma.hbm_to_vmem [thread:$0]  (!%p1083_p8), %s145_s4, 1024, %s147_s30, %s135_s6, %s1011_s19, %s1011_s19, %s1012_s21  }
  0x1c   : > { %p154_p4 = scmp.lt.s32.totalorder %s1009_s15, 5 }
  0x1e   : > { %p155_p5 = pnand %p864_p9, %p154_p4 }
  0x1f   : > { %s160_s23 = sand.u32 (!%p155_p5), 1, %s1001_s13  }
  0x20   : > { %158 = sbr.rel (%p155_p5) target bundleno = 309 (0x135), region = 32  ;;  %s865_s24 = sshll.u32 (!%p155_p5), %s160_s23, 6 }
  0x21   : > { %s161_s25 = scalar_lea.sflag (!%p155_p5), [#allocation3], %s160_s23  ;;  %s1102_s26 = scalar_lea.vmem (!%p155_p5), [#allocation2], %s865_s24 }
  0x25   : > { %992 = dma.done.wait (%p1072_p7), %s161_s25, 1024  }
  0x26   : > { %994 = vsyncadd (%p1072_p7), %s161_s25, 4294966272  ;;  %v218_v0 = vld [vmem:[%s1602_s1 + $0x78] sm:$0xff]  ;;  %v217_v1 = vld [vmem:[%s1602_s1 + $0x70] sm:$0xff]  ;;  %s866_s12 = sshll.u32 %s857_s16, 3  ;;  %vm781_vm0 = vcmask 64512  }
  0x27   : > { %v216_v2 = vld [vmem:[%s1602_s1 + $0x68] sm:$0xff]  ;;  %v1117_v3 = vand.u32 4294901760, %v218_v0  ;;  %v1119_v4 = vand.u32 4294901760, %v217_v1  ;;  %v215_v6 = vld [vmem:[%s1602_s1 + $0x60] sm:$0xff]  ;;  %v214_v7 = vld [vmem:[%s1602_s1 + $0x58] sm:$0xff]  ;;  %p190_p6 = scmp.lt.s32.totalorder %s866_s12, 31 }
  0x28   : > { %v1121_v5 = vand.u32 4294901760, %v216_v2  ;;  %v213_v8 = vld [vmem:[%s1602_s1 + $0x50] sm:$0xff]  ;;  %v1132_v9 = vand.u32 4294901760, %v215_v6  ;;  %v1134_v10 = vand.u32 4294901760, %v214_v7  ;;  %v212_v12 = vld [vmem:[%s1602_s1 + $0x48] sm:$0xff]  ;;  %v211_v13 = vld [vmem:[%s1602_s1 + $0x40] sm:$0xff] }
  0x29   : > { %v1136_v11 = vand.u32 4294901760, %v213_v8  ;;  %871 = vmatpush.msra.mxu2 %v1117_v3  ;;  %v1146_v14 = vsub.f32 %v218_v0, %v1117_v3  ;;  %v1149_v15 = vsub.f32 %v217_v1, %v1119_v4  ;;  %224 = vmatpush.msra.mxu0 %v1117_v3  ;;  %v210_v17 = vld [vmem:[%s1602_s1 + $0x38] sm:$0xff]  ;;  %v1158_v18 = vand.u32 4294901760, %v212_v12  ;;  %v209_v25 = vld [vmem:[%s1602_s1 + $0x30] sm:$0xff]  ;;  %v208_v33 = vld [vmem:[%s1602_s1 + $0x28] sm:$0xff]  ;;  %s1633_s12 = smov (!%p190_p6, %s866_s12), 31 }
  0x2a   : > { %v1152_v16 = vsub.f32 %v216_v2, %v1121_v5  ;;  %v1161_v19 = vsub.f32 %v215_v6, %v1132_v9  ;;  %v1164_v20 = vsub.f32 %v214_v7, %v1134_v10  ;;  %v1170_v24 = vand.u32 4294901760, %v211_v13  ;;  %v207_v42 = vld [vmem:[%s1602_s1 + $0x20] sm:$0xff]  ;;  %v206_v49 = vld [vmem:[%s1602_s1 + $0x18] sm:$0xff]  ;;  %v205_v55 = vld [vmem:[%s1602_s1 + $0x10] sm:$0xff]  ;;  %s867_s18 = sshll.u32 %s1633_s12, 3 }
  0x2b   : > { %872 = vmatpush.msra.mxu2 %v1119_v4  ;;  %v322_v21 = vand.u32 4294901760, %v1146_v14  ;;  %v328_v22 = vand.u32 4294901760, %v1149_v15  ;;  %226 = vmatpush.msra.mxu0 %v1119_v4  ;;  %v1177_v27 = vand.u32 4294901760, %v210_v17  ;;  %v1180_v28 = vsub.f32 %v213_v8, %v1136_v11  ;;  %v199_v47 = vld [vmem:[%s1102_s26 + $0x20] sm:$0xff]  ;;  %v204_v62 = vld [vmem:[%s1602_s1 + $0x8] sm:$0xff]  ;;  %s1557_s19 = scalar_lea.vmem %s1604_s3, %s867_s18 }
  0x2c   : > { %v334_v23 = vand.u32 4294901760, %v1152_v16  ;;  %v340_v26 = vand.u32 4294901760, %v1161_v19  ;;  %v346_v32 = vand.u32 4294901760, %v1164_v20  ;;  %v1200_v35 = vand.u32 4294901760, %v209_v25  ;;  %v203_v2 = vld [vmem:[%s1602_s1] sm:$0xff] }
  0x2d   : > { %873 = vmatpush.msra.mxu2 %v1121_v5  ;;  %v323_v29 = vsub.f32 %v1146_v14, %v322_v21  ;;  %v329_v30 = vsub.f32 %v1149_v15, %v328_v22  ;;  %228 = vmatpush.msra.mxu0 %v1121_v5  ;;  %v1203_v36 = vsub.f32 %v212_v12, %v1158_v18  ;;  %v352_v39 = vand.u32 4294901760, %v1180_v28  ;;  %v195_v12 = vld [vmem:[%s1102_s26] sm:$0xff] }
  0x2e   : > { %v335_v31 = vsub.f32 %v1152_v16, %v334_v23  ;;  %v341_v34 = vsub.f32 %v1161_v19, %v340_v26  ;;  %v1209_v40 = vsub.f32 %v211_v13, %v1170_v24  ;;  %v1211_v41 = vand.u32 4294901760, %v208_v33 }
  0x2f   : > { %874 = vmatpush.msra.mxu2 %v1132_v9  ;;  %v324_v37 = vand.u32 4294901760, %v323_v29  ;;  %v330_v38 = vand.u32 4294901760, %v329_v30  ;;  %230 = vmatpush.msra.mxu0 %v1132_v9  ;;  %v347_v44 = vsub.f32 %v1164_v20, %v346_v32  ;;  %v358_v45 = vand.u32 4294901760, %v1203_v36  ;;  %v200_v30 = vld [vmem:[%s1102_s26 + $0x28] sm:$0xff] }
  0x30   : > { %v336_v43 = vand.u32 4294901760, %v335_v31  ;;  %v1222_v46 = vsub.f32 %v210_v17, %v1177_v27  ;;  %v1614_v48 = vand.u32 4294901760, %v1209_v40  ;;  %v342_v50 = vand.u32 4294901760, %v341_v34 }
  0x31   : > { %875 = vmatpush.msra.mxu2 %v1134_v10  ;;  %887 = vmatpush.msra.mxu3 %v324_v37  ;;  %v353_v51 = vsub.f32 %v1180_v28, %v352_v39  ;;  %v1234_v52 = vand.u32 4294901760, %v207_v42  ;;  %v1237_v53 = vsub.f32 %v209_v25, %v1200_v35  ;;  %v1244_v56 = vand.u32 4294901760, %v199_v47 }
  0x32   : > { %325 = vmatpush.msra.mxu1 %v324_v37  ;;  %232 = vmatpush.msra.mxu0 %v1134_v10  ;;  %v1613_v54 = vand.u32 4294901760, %v1222_v46  ;;  %v348_v57 = vand.u32 4294901760, %v347_v44  ;;  %v359_v58 = vsub.f32 %v1203_v36, %v358_v45  ;;  %v1250_v59 = vand.u32 4294901760, %v206_v49 }
  0x33   : > { %876 = vmatpush.msra.mxu2 %v1136_v11  ;;  %888 = vmatpush.msra.mxu3 %v330_v38  ;;  %v1253_v60 = vsub.f32 %v208_v33, %v1211_v41  ;;  %v365_v61 = vsub.f32 %v1209_v40, %v1614_v48  ;;  %v354_v63 = vand.u32 4294901760, %v353_v51  ;;  %v1263_v0 = vand.u32 4294901760, %v205_v55  ;;  %v202_v48 = vld [vmem:[%s1102_s26 + $0x38] sm:$0xff] }
  0x34   : > { %331 = vmatpush.msra.mxu1 %v330_v38  ;;  %234 = vmatpush.msra.mxu0 %v1136_v11  ;;  %v1609_v1 = vand.u32 4294901760, %v1237_v53  ;;  %v1270_v6 = vsub.f32 %v207_v42, %v1234_v52  ;;  %v371_v7 = vsub.f32 %v1222_v46, %v1613_v54  ;;  %v1277_v8 = vsub.f32 %v199_v47, %v1244_v56 }
  0x35   : > { %877 = vmatpush.msra.mxu2 %v1158_v18  ;;  %889 = vmatpush.msra.mxu3 %v336_v43  ;;  %v360_v13 = vand.u32 4294901760, %v359_v58  ;;  %v1281_v17 = vand.u32 4294901760, %v204_v62  ;;  %v1607_v25 = vand.u32 4294901760, %v1253_v60  ;;  %v1285_v29 = vsub.f32 %v206_v49, %v1250_v59 }
  0x36   : > { %337 = vmatpush.msra.mxu1 %v336_v43  ;;  %236 = vmatpush.msra.mxu0 %v1158_v18  ;;  %v366_v31 = vand.u32 4294901760, %v365_v61  ;;  %v1288_v33 = vand.u32 4294901760, %v203_v2  ;;  %v377_v34 = vsub.f32 %v1237_v53, %v1609_v1  ;;  %v1606_v37 = vand.u32 4294901760, %v1270_v6 }
  0x37   : > { %878 = vmatpush.msra.mxu2 %v1170_v24  ;;  %890 = vmatpush.msra.mxu3 %v342_v50  ;;  %v1297_v38 = vsub.f32 %v205_v55, %v1263_v0  ;;  %v1299_v42 = vand.u32 4294901760, %v195_v12  ;;  %v372_v43 = vand.u32 4294901760, %v371_v7  ;;  %v1605_v44 = vand.u32 4294901760, %v1277_v8 }
  0x38   : > { %343 = vmatpush.msra.mxu1 %v342_v50  ;;  %238 = vmatpush.msra.mxu0 %v1170_v24  ;;  %v1303_v47 = vand.u32 4294901760, %v200_v30  ;;  %v383_v49 = vsub.f32 %v1253_v60, %v1607_v25  ;;  %v1608_v50 = vand.u32 4294901760, %v1285_v29  ;;  %v1311_v51 = vsub.f32 %v204_v62, %v1281_v17 }
  0x39   : > { %879 = vmatpush.msra.mxu2 %v1177_v27  ;;  %891 = vmatpush.msra.mxu3 %v348_v57  ;;  %v1314_v55 = vsub.f32 %v195_v12, %v1299_v42  ;;  %v389_v58 = vsub.f32 %v1270_v6, %v1606_v37  ;;  %v1610_v61 = vand.u32 4294901760, %v1297_v38  ;;  %v1323_v62 = vsub.f32 %v203_v2, %v1288_v33  ;;  %v196_v37 = vld [vmem:[%s1102_s26 + $0x8] sm:$0xff] }
  0x3a   : > { %349 = vmatpush.msra.mxu1 %v348_v57  ;;  %240 = vmatpush.msra.mxu0 %v1177_v27  ;;  %v378_v57 = vand.u32 4294901760, %v377_v34  ;;  %v1330_v7 = vsub.f32 %v200_v30, %v1303_v47  ;;  %v395_v2 = vsub.f32 %v1285_v29, %v1608_v50  ;;  %v1612_v34 = vand.u32 4294901760, %v1311_v51 }
  0x3b   : > { %880 = vmatpush.msra.mxu2 %v1200_v35  ;;  %892 = vmatpush.msra.mxu3 %v354_v63  ;;  %v1611_v12 = vand.u32 4294901760, %v1314_v55  ;;  %v390_v30 = vand.u32 4294901760, %v389_v58 }
  0x3c   : > { %355 = vmatpush.msra.mxu1 %v354_v63  ;;  %242 = vmatpush.msra.mxu0 %v1200_v35  ;;  %v290_v63 = vsub.f32 %v1277_v8, %v1605_v44  ;;  %v201_v44 = vld [vmem:[%s1102_s26 + $0x30] sm:$0xff]  ;;  %v297_v50 = vand.u32 4294901760, %v1330_v7  ;;  %v396_v58 = vand.u32 4294901760, %v395_v2 }
  0x3d   : > { %881 = vmatpush.msra.mxu2 %v1211_v41  ;;  %893 = vmatpush.msra.mxu3 %v360_v13  ;;  %v1351_v1 = vand.u32 4294901760, %v201_v44 }
  0x3e   : > { %361 = vmatpush.msra.mxu1 %v360_v13  ;;  %244 = vmatpush.msra.mxu0 %v1211_v41  ;;  %v384_v13 = vand.u32 4294901760, %v383_v49  ;;  %v412_v49 = vand.u32 4294901760, %v1323_v62  ;;  %v291_v25 = vand.u32 4294901760, %v290_v63  ;;  %v298_v2 = vsub.f32 %v1330_v7, %v297_v50 }
  0x3f   : > { %882 = vmatpush.msra.mxu2 %v1234_v52  ;;  %894 = vmatpush.msra.mxu3 %v366_v31 }
  0x40   : > { %367 = vmatpush.msra.mxu1 %v366_v31  ;;  %246 = vmatpush.msra.mxu0 %v1234_v52  ;;  %v401_v31 = vsub.f32 %v1297_v38, %v1610_v61  ;;  %v407_v61 = vsub.f32 %v1311_v51, %v1612_v34 }
  0x41   : > { %883 = vmatpush.msra.mxu2 %v1250_v59  ;;  %895 = vmatpush.msra.mxu3 %v372_v43 }
  0x42   : > { %373 = vmatpush.msra.mxu1 %v372_v43  ;;  %248 = vmatpush.msra.mxu0 %v1250_v59  ;;  %v258_v43 = vsub.f32 %v1314_v55, %v1611_v12  ;;  %v402_v63 = vand.u32 4294901760, %v401_v31  ;;  %v413_v12 = vsub.f32 %v1323_v62, %v412_v49  ;;  %v408_v54 = vand.u32 4294901760, %v407_v61  ;;  %v197_v61 = vld [vmem:[%s1102_s26 + $0x10] sm:$0xff] }
  0x43   : > { %884 = vmatpush.msra.mxu2 %v1263_v0  ;;  %896 = vmatpush.msra.mxu3 %v378_v57 }
  0x44   : > { %379 = vmatpush.msra.mxu1 %v378_v57  ;;  %250 = vmatpush.msra.mxu0 %v1263_v0  ;;  %v1358_v57 = vand.u32 4294901760, %v196_v37  ;;  %v259_v34 = vand.u32 4294901760, %v258_v43  ;;  %v1378_v43 = vand.u32 4294901760, %v202_v48 }
  0x45   : > { %885 = vmatpush.msra.mxu2 %v1281_v17  ;;  %897 = vmatpush.msra.mxu3 %v384_v13 }
  0x46   : > { %385 = vmatpush.msra.mxu1 %v384_v13  ;;  %252 = vmatpush.msra.mxu0 %v1281_v17  ;;  %v1368_v13 = vsub.f32 %v201_v44, %v1351_v1  ;;  %v1374_v31 = vsub.f32 %v196_v37, %v1358_v57 }
  0x47   : > { %886 = vmatpush.msra.mxu2 %v1288_v33  ;;  %898 = vmatpush.msra.mxu3 %v390_v30 }
  0x48   : > { %292 = vmatmul.f32.vlgmr.msra.gmra.mxu2 %v291_v25  ;;  %391 = vmatpush.msra.mxu1 %v390_v30  ;;  %v414_v25 = vand.u32 4294901760, %v413_v12  ;;  %v299_v30 = vand.u32 4294901760, %v298_v2  ;;  %v305_v44 = vand.u32 4294901760, %v1368_v13  ;;  %v265_v37 = vand.u32 4294901760, %v1374_v31 }
  0x49   : > { %899 = vmatpush.msra.mxu3 %v396_v58  ;;  %451 = vmatpush.msrb.mxu2 %v1146_v14 }
  0x4a   : > { %397 = vmatpush.msra.mxu1 %v396_v58  ;;  %254 = vmatpush.msra.mxu0 %v1288_v33  ;;  %v306_v12 = vsub.f32 %v1368_v13, %v305_v44  ;;  %v266_v14 = vsub.f32 %v1374_v31, %v265_v37 }
  0x4b   : > { %900 = vmatpush.msra.mxu3 %v402_v63  ;;  %454 = vmatpush.msrb.mxu2 %v1149_v15 }
  0x4c   : > { %403 = vmatpush.msra.mxu1 %v402_v63  ;;  %260 = vmatmul.f32.vlgmr.msra.gmra.mxu0 %v259_v34  ;;  %v1391_v34 = vsub.f32 %v202_v48, %v1378_v43  ;;  %v307_v48 = vand.u32 4294901760, %v306_v12 }
  0x4d   : > { %901 = vmatpush.msra.mxu3 %v408_v54  ;;  %457 = vmatpush.msrb.mxu2 %v1152_v16 }
  0x4e   : > { %409 = vmatpush.msra.mxu1 %v408_v54  ;;  %622 = vmatpush.msrb.mxu0 %v322_v21  ;;  %v1400_v21 = vand.u32 4294901760, %v197_v61  ;;  %v313_v15 = vand.u32 4294901760, %v1391_v34 }
  0x4f   : > { %902 = vmatpush.msra.mxu3 %v414_v25  ;;  %460 = vmatpush.msrb.mxu2 %v1161_v19 }
  0x50   : > { %300 = vmatmul.f32.gmra.mxu2 %v299_v30  ;;  %433 = vmatmul.f32.vlgmr.msra.gmra.mxu3 %v1244_v56  ;;  %v1414_v54 = vsub.f32 %v197_v61, %v1400_v21  ;;  %v314_v16 = vsub.f32 %v1391_v34, %v313_v15 }
  0x51   : > { %539 = vmatpush.msrb.mxu3 %v1117_v3  ;;  %463 = vmatpush.msrb.mxu2 %v1164_v20 }
  0x52   : > { %415 = vmatpush.msra.mxu1 %v414_v25  ;;  %626 = vmatpush.msrb.mxu0 %v328_v22  ;;  %v267_v22 = vand.u32 4294901760, %v266_v14 }
  0x53   : > { %541 = vmatpush.msrb.mxu3 %v1119_v4  ;;  %466 = vmatpush.msrb.mxu2 %v1180_v28  ;;  %v1618_v28 = vand.u32 4294901760, %v1209_v40 }
  0x54   : > { %417 = vmatmul.f32.vlgmr.msra.gmra.mxu1 %v1299_v42  ;;  %630 = vmatpush.msrb.mxu0 %v334_v23  ;;  %v198_v23 = vld [vmem:[%s1102_s26 + $0x18] sm:$0xff] }
  0x55   : > { %543 = vmatpush.msrb.mxu3 %v1121_v5  ;;  %469 = vmatpush.msrb.mxu2 %v1203_v36  ;;  %v1429_v19 = vand.u32 4294901760, %v198_v23  ;;  %v1621_v36 = vand.u32 4294901760, %v1253_v60 }
  0x56   : > { %717 = vmatpush.msrb.mxu1 %v1117_v3  ;;  %634 = vmatpush.msrb.mxu0 %v340_v26  ;;  %v273_v3 = vand.u32 4294901760, %v1414_v54  ;;  %v315_v26 = vand.u32 4294901760, %v314_v16 }
  0x57   : > { %545 = vmatpush.msrb.mxu3 %v1132_v9  ;;  %472 = vmatpush.msrb.mxu2 %v1209_v40  ;;  %v1626_v40 = vand.u32 4294901760, %v1311_v51 }
  0x58   : > { %308 = vmatmul.f32.gmra.mxu2 %v307_v48  ;;  %437 = vmatmul.f32.gmra.mxu3 %v1303_v47 }
  0x59   : > { %547 = vmatpush.msrb.mxu3 %v1134_v10  ;;  %475 = vmatpush.msrb.mxu2 %v1222_v46 }
  0x5a   : > { %719 = vmatpush.msrb.mxu1 %v1119_v4  ;;  %268 = vmatmul.f32.gmra.mxu0 %v267_v22  ;;  %v274_v4 = vsub.f32 %v1414_v54, %v273_v3 }
  0x5b   : > { %549 = vmatpush.msrb.mxu3 %v1136_v11  ;;  %478 = vmatpush.msrb.mxu2 %v1237_v53 }
  0x5c   : > { %721 = vmatpush.msrb.mxu1 %v1121_v5  ;;  %638 = vmatpush.msrb.mxu0 %v346_v32  ;;  %v280_v5 = vsub.f32 %v198_v23, %v1429_v19 }
  0x5d   : > { %551 = vmatpush.msrb.mxu3 %v1158_v18  ;;  %481 = vmatpush.msrb.mxu2 %v1253_v60 }
  0x5e   : > { %723 = vmatpush.msrb.mxu1 %v1132_v9  ;;  %642 = vmatpush.msrb.mxu0 %v352_v39  ;;  %v275_v9 = vand.u32 4294901760, %v274_v4  ;;  %v281_v20 = vand.u32 4294901760, %v280_v5  ;;  %v1623_v39 = vand.u32 4294901760, %v1314_v55 }
  0x5f   : > { %553 = vmatpush.msrb.mxu3 %v1170_v24  ;;  %484 = vmatpush.msrb.mxu2 %v1270_v6 }
  0x60   : > { %316 = vmatmul.f32.gmra.mxu2 %v315_v26  ;;  %441 = vmatmul.f32.gmra.mxu3 %v1351_v1  ;;  %v282_v32 = vsub.f32 %v280_v5, %v281_v20 }
  0x61   : > { %555 = vmatpush.msrb.mxu3 %v1177_v27  ;;  %487 = vmatpush.msrb.mxu2 %v1285_v29 }
  0x62   : > { %421 = vmatmul.f32.gmra.mxu1 %v1358_v57  ;;  %646 = vmatpush.msrb.mxu0 %v358_v45 }
  0x63   : > { %557 = vmatpush.msrb.mxu3 %v1200_v35  ;;  %725 = vmatpush.msrb.mxu1 %v1134_v10  ;;  %v1619_v10 = vand.u32 4294901760, %v1222_v46 }
  0x64   : > { %490 = vmatpush.msrb.mxu2 %v1297_v38  ;;  %650 = vmatpush.msrb.mxu0 %v1618_v28 }
  0x65   : > { %559 = vmatpush.msrb.mxu3 %v1211_v41  ;;  %727 = vmatpush.msrb.mxu1 %v1136_v11  ;;  %v283_v11 = vand.u32 4294901760, %v282_v32 }
  0x66   : > { %493 = vmatpush.msrb.mxu2 %v1311_v51  ;;  %276 = vmatmul.f32.gmra.mxu0 %v275_v9 }
  0x67   : > { %561 = vmatpush.msrb.mxu3 %v1234_v52  ;;  %729 = vmatpush.msrb.mxu1 %v1158_v18  ;;  %v1620_v18 = vand.u32 4294901760, %v1237_v53 }
  0x68   : > { %496 = vmatpush.msrb.mxu2 %v1323_v62  ;;  %445 = vmatmul.f32.gmra.mxu3 %v1378_v43 }
  0x69   : > { %499 = vmatmul.f32.vlgmr.msrb.gmra.mxu2 %v1314_v55  ;;  %563 = vmatpush.msrb.mxu3 %v1250_v59 }
  0x6a   : > { %654 = vmatpush.msrb.mxu0 %v1619_v10  ;;  %731 = vmatpush.msrb.mxu1 %v1170_v24  ;;  %v1622_v24 = vand.u32 4294901760, %v1270_v6 }
  0x6b   : > { %425 = vmatmul.f32.gmra.mxu1 %v1400_v21  ;;  %565 = vmatpush.msrb.mxu3 %v1263_v0 }
  0x6c   : > { %658 = vmatpush.msrb.mxu0 %v1620_v18  ;;  %733 = vmatpush.msrb.mxu1 %v1177_v27  ;;  %v1624_v27 = vand.u32 4294901760, %v1285_v29 }
  0x6d   : > { %567 = vmatpush.msrb.mxu3 %v1281_v17 }
  0x6e   : > { %662 = vmatpush.msrb.mxu0 %v1621_v36  ;;  %735 = vmatpush.msrb.mxu1 %v1200_v35  ;;  %v1625_v35 = vand.u32 4294901760, %v1297_v38 }
  0x6f   : > { %569 = vmatpush.msrb.mxu3 %v1288_v33  ;;  %284 = vmatmul.f32.gmra.mxu0 %v283_v11 }
  0x70   : > { %666 = vmatpush.msrb.mxu0 %v1622_v24  ;;  %737 = vmatpush.msrb.mxu1 %v1211_v41  ;;  %v1627_v41 = vand.u32 4294901760, %v1277_v8 }
  0x71   : > { %504 = vmatmul.f32.gmra.mxu2 %v1374_v31  ;;  %573 = vmatmul.f32.vlgmr.msrb.gmra.mxu3 %v1623_v39 }
  0x72   : > { %670 = vmatpush.msrb.mxu0 %v1624_v27  ;;  %739 = vmatpush.msrb.mxu1 %v1234_v52 }
  0x73   : > { %429 = vmatmul.f32.gmra.mxu1 %v1429_v19 }
  0x74   : > { %674 = vmatpush.msrb.mxu0 %v1625_v35  ;;  %741 = vmatpush.msrb.mxu1 %v1250_v59 }
  0x76   : > { %678 = vmatpush.msrb.mxu0 %v1626_v40  ;;  %743 = vmatpush.msrb.mxu1 %v1263_v0 }
  0x78   : > { %682 = vmatpush.msrb.mxu0 %v412_v49  ;;  %745 = vmatpush.msrb.mxu1 %v1281_v17 }
  0x79   : > { %509 = vmatmul.f32.gmra.mxu2 %v1414_v54  ;;  %579 = vmatmul.f32.gmra.mxu3 %v265_v37 }
  0x7a   : > { %684 = vmatmul.f32.vlgmr.msrb.gmra.mxu0 %v1299_v42  ;;  %747 = vmatpush.msrb.mxu1 %v1288_v33  ;;  %v1546_v33 = vld [vmem:[%s1603_s2] ss:$0 sm:$0xff] }
  0x7b   : > { %749 = vmatmul.f32.vlgmr.msrb.gmra.mxu1 %v1299_v42 }
  0x81   : > { %514 = vmatmul.f32.gmra.mxu2 %v280_v5  ;;  %585 = vmatmul.f32.gmra.mxu3 %v273_v3 }
  0x82   : > { %688 = vmatmul.f32.gmra.mxu0 %v1358_v57 }
  0x83   : > { %753 = vmatmul.f32.gmra.mxu1 %v1358_v57 }
  0x89   : > { %519 = vmatmul.f32.gmra.mxu2 %v1277_v8  ;;  %591 = vmatmul.f32.gmra.mxu3 %v281_v20 }
  0x8a   : > { %692 = vmatmul.f32.gmra.mxu0 %v1400_v21 }
  0x8b   : > { %757 = vmatmul.f32.gmra.mxu1 %v1400_v21 }
  0x91   : > { %524 = vmatmul.f32.gmra.mxu2 %v1330_v7  ;;  %597 = vmatmul.f32.gmra.mxu3 %v1627_v41 }
  0x92   : > { %696 = vmatmul.f32.gmra.mxu0 %v1429_v19 }
  0x93   : > { %761 = vmatmul.f32.gmra.mxu1 %v1429_v19 }
  0x99   : > { %529 = vmatmul.f32.gmra.mxu2 %v1368_v13  ;;  %603 = vmatmul.f32.gmra.mxu3 %v297_v50 }
  0x9a   : > { %700 = vmatmul.f32.gmra.mxu0 %v1244_v56 }
  0x9b   : > { %765 = vmatmul.f32.gmra.mxu1 %v1244_v56 }
  0xa1   : > { %534 = vmatmul.f32.gmra.mxu2 %v1391_v34  ;;  %609 = vmatmul.f32.gmra.mxu3 %v305_v44 }
  0xa2   : > { %704 = vmatmul.f32.gmra.mxu0 %v1303_v47 }
  0xa3   : > { %769 = vmatmul.f32.gmra.mxu1 %v1303_v47 }
  0xa9   : > { %615 = vmatmul.f32.gmra.mxu3 %v313_v15 }
  0xaa   : > { %708 = vmatmul.f32.gmra.mxu0 %v1351_v1 }
  0xab   : > { %773 = vmatmul.f32.gmra.mxu1 %v1351_v1 }
  0xb2   : > { %712 = vmatmul.f32.gmra.mxu0 %v1378_v43 }
  0xb3   : > { %777 = vmatmul.f32.gmra.mxu1 %v1378_v43 }
  0xc9   : > { %v261_v46 = vpop.f32.mrf.mxu0 }
  0xca   : > { %v262_v47 = vadd.f32 %v1546_v33, %v261_v46 }
  0xcb   : > { %v293_v45 = vpop.f32.mrf.mxu2 }
  0xcc   : > { %v294_v32 = vadd.f32 %v1546_v33, %v293_v45 }
  0xd1   : > { %v418_v56 = vpop.f32.mrf.mxu1 }
  0xd2   : > { %v419_v55 = vadd.f32 %v418_v56, %v262_v47 }
  0xd3   : > { %v1531_v52 = vpop.f32.mrf.mxu2  ;;  %v1533_v53 = vpop.f32.mrf.mxu3 }
  0xd4   : > { %v435_v24 = vadd.f32 %v1533_v53, %v294_v32  ;;  %v302_v41 = vadd.f32 %v1546_v33, %v1531_v52 }
  0xd7   : > { %v269_v59 = vpop.f32.mrf.mxu0 }
  0xd8   : > { %v270_v58 = vadd.f32 %v1546_v33, %v269_v59 }
  0xdb   : > { %v1535_v60 = vpop.f32.mrf.mxu2  ;;  %v1537_v0 = vpop.f32.mrf.mxu3 }
  0xdf   : > { %v422_v6 = vpop.f32.mrf.mxu1 }
  0xe0   : > { %v423_v31 = vadd.f32 %v422_v6, %v270_v58  ;;  %v439_v6 = vadd.f32 %v1537_v0, %v302_v41 }
  0xe3   : > { %v1539_v8 = vpop.f32.mrf.mxu2  ;;  %v1541_v1 = vpop.f32.mrf.mxu3 }
  0xe4   : > { %v277_v17 = vpop.f32.mrf.mxu0  ;;  %v318_v58 = vadd.f32 %v1546_v33, %v1539_v8 }
  0xe5   : > { %v278_v37 = vadd.f32 %v1546_v33, %v277_v17 }
  0xe8   : > { %v426_v29 = vpop.f32.mrf.mxu1 }
  0xe9   : > { %v427_v21 = vadd.f32 %v426_v29, %v278_v37 }
  0xeb   : > { %v1548_v38 = vpop.f32.mrf.mxu3 }
  0xec   : > { %v500_v42 = vpop.f32.mrf.mxu2  ;;  %v285_v50 = vpop.f32.mrf.mxu0 }
  0xed   : > { %v501_v62 = vadd.f32 %v500_v42, %v419_v55  ;;  %v286_v16 = vadd.f32 %v1546_v33, %v285_v50  ;;  %v310_v42 = vadd.f32 %v1546_v33, %v1535_v60 }
  0xf0   : > { %v430_v51 = vpop.f32.mrf.mxu1 }
  0xf1   : > { %v431_v4 = vadd.f32 %v430_v51, %v286_v16 }
  0xf4   : > { %v505_v7 = vpop.f32.mrf.mxu2  ;;  %v574_v49 = vpop.f32.mrf.mxu3 }
  0xf5   : > { %v575_v57 = vadd.f32 %v574_v49, %v501_v62  ;;  %v506_v30 = vadd.f32 %v505_v7, %v423_v31  ;;  %v443_v62 = vadd.f32 %v1541_v1, %v310_v42  ;;  %v447_v31 = vadd.f32 %v1548_v38, %v318_v58 }
  0xf7   : > { %v685_v63 = vpop.f32.mrf.mxu0 }
  0xf8   : > { %v686_v2 = vadd.f32 %v685_v63, %v575_v57  ;;  %v750_v13 = vpop.f32.mrf.mxu1 }
  0xfa   : > { %v751_v25 = vadd.f32 %v750_v13, %v686_v2 }
  0xfc   : > { %782 = vst.msk [vmem:[%s1557_s19] sm:$0xff] %vm781_vm0, %v751_v25  ;;  %v510_v44 = vpop.f32.mrf.mxu2  ;;  %v580_v43 = vpop.f32.mrf.mxu3 }
  0xfd   : > { %v581_v61 = vadd.f32 %v580_v43, %v506_v30  ;;  %v511_v15 = vadd.f32 %v510_v44, %v427_v21 }
  0xff   : > { %v689_v12 = vpop.f32.mrf.mxu0 }
 0x100   : > { %v690_v34 = vadd.f32 %v689_v12, %v581_v61  ;;  %v754_v14 = vpop.f32.mrf.mxu1 }
 0x102   : > { %v755_v48 = vadd.f32 %v754_v14, %v690_v34 }
 0x104   : > { %783 = vst.msk [vmem:[%s1557_s19 + $0x8] sm:$0xff] %vm781_vm0, %v755_v48  ;;  %v515_v22 = vpop.f32.mrf.mxu2  ;;  %v586_v54 = vpop.f32.mrf.mxu3 }
 0x105   : > { %v587_v23 = vadd.f32 %v586_v54, %v511_v15  ;;  %v516_v9 = vadd.f32 %v515_v22, %v431_v4 }
 0x107   : > { %v693_v3 = vpop.f32.mrf.mxu0 }
 0x108   : > { %v694_v19 = vadd.f32 %v693_v3, %v587_v23  ;;  %v758_v26 = vpop.f32.mrf.mxu1 }
 0x10a   : > { %v759_v5 = vadd.f32 %v758_v26, %v694_v19 }
 0x10c   : > { %784 = vst.msk [vmem:[%s1557_s19 + $0x10] sm:$0xff] %vm781_vm0, %v759_v5  ;;  %v520_v20 = vpop.f32.mrf.mxu2  ;;  %v592_v28 = vpop.f32.mrf.mxu3 }
 0x10d   : > { %v593_v10 = vadd.f32 %v592_v28, %v516_v9  ;;  %v521_v27 = vadd.f32 %v520_v20, %v435_v24 }
 0x10f   : > { %v697_v11 = vpop.f32.mrf.mxu0 }
 0x110   : > { %v698_v18 = vadd.f32 %v697_v11, %v593_v10  ;;  %v762_v36 = vpop.f32.mrf.mxu1 }
 0x112   : > { %v763_v39 = vadd.f32 %v762_v36, %v698_v18 }
 0x114   : > { %785 = vst.msk [vmem:[%s1557_s19 + $0x18] sm:$0xff] %vm781_vm0, %v763_v39  ;;  %v525_v35 = vpop.f32.mrf.mxu2  ;;  %v598_v40 = vpop.f32.mrf.mxu3 }
 0x115   : > { %v599_v46 = vadd.f32 %v598_v40, %v521_v27  ;;  %v526_v29 = vadd.f32 %v525_v35, %v439_v6 }
 0x117   : > { %v701_v56 = vpop.f32.mrf.mxu0 }
 0x118   : > { %v702_v59 = vadd.f32 %v701_v56, %v599_v46  ;;  %v766_v45 = vpop.f32.mrf.mxu1 }
 0x11a   : > { %v767_v17 = vadd.f32 %v766_v45, %v702_v59 }
 0x11c   : > { %786 = vst.msk [vmem:[%s1557_s19 + $0x20] sm:$0xff] %vm781_vm0, %v767_v17  ;;  %v604_v53 = vpop.f32.mrf.mxu3  ;;  %v530_v50 = vpop.f32.mrf.mxu2 }
 0x11d   : > { %v605_v47 = vadd.f32 %v604_v53, %v526_v29  ;;  %v531_v49 = vadd.f32 %v530_v50, %v443_v62 }
 0x11f   : > { %v705_v51 = vpop.f32.mrf.mxu0 }
 0x120   : > { %v706_v55 = vadd.f32 %v705_v51, %v605_v47  ;;  %v770_v52 = vpop.f32.mrf.mxu1 }
 0x122   : > { %v771_v7 = vadd.f32 %v770_v52, %v706_v55 }
 0x124   : > { %787 = vst.msk [vmem:[%s1557_s19 + $0x28] sm:$0xff] %vm781_vm0, %v771_v7  ;;  %v610_v0 = vpop.f32.mrf.mxu3  ;;  %v535_v60 = vpop.f32.mrf.mxu2 }
 0x125   : > { %v611_v57 = vadd.f32 %v610_v0, %v531_v49  ;;  %v536_v30 = vadd.f32 %v535_v60, %v447_v31 }
 0x127   : > { %v709_v63 = vpop.f32.mrf.mxu0 }
 0x128   : > { %v710_v2 = vadd.f32 %v709_v63, %v611_v57  ;;  %v774_v13 = vpop.f32.mrf.mxu1 }
 0x12a   : > { %v775_v25 = vadd.f32 %v774_v13, %v710_v2 }
 0x12c   : > { %788 = vst.msk [vmem:[%s1557_s19 + $0x30] sm:$0xff] %vm781_vm0, %v775_v25  ;;  %v616_v1 = vpop.f32.mrf.mxu3 }
 0x12d   : > { %v617_v44 = vadd.f32 %v616_v1, %v536_v30 }
 0x12f   : > { %v713_v43 = vpop.f32.mrf.mxu0 }
 0x130   : > { %v714_v37 = vadd.f32 %v713_v43, %v617_v44  ;;  %v778_v61 = vpop.f32.mrf.mxu1 }
 0x132   : > { %v779_v12 = vadd.f32 %v778_v61, %v714_v37 }
 0x134   : > { %789 = vst.msk [vmem:[%s1557_s19 + $0x38] sm:$0xff] %vm781_vm0, %v779_v12 }
 0x135 PF: > { %p13_p7 = scmp.ge.s32.totalorder %s1053_s17, 6   ;;  %s1628_s12 = smov %s1001_s13 }
 0x136   : > { %s1629_s13 = smov %s1005_s14  ;;  %s1630_s14 = smov %s1063_s20 }
 0x137   : > { %s1631_s15 = smov %s1053_s17  ;;  %15 = sbr.rel (!%p13_p7) target bundleno = 3 (0x3), region = 72 }
 0x13c   :  { %812 = vsyncpa [#allocation3], 1 }
 0x13d   :  { %814 = vsyncpa [#allocation3 + $0x1], 1 }

</bundles_post_ra>
